<compile_context>
chip_gen: v5e
topology: v5e:2x2
jax: 0.10.0
libtpu: 0.0.40
codegen_flags: <defaults>
</compile_context>

<pallas_src>
import functools

import jax
import jax.numpy as jnp
from jax import lax
from jax.experimental import pallas as pl
from jax.experimental.pallas import tpu as pltpu

SR_IN = 8000                            # backbone input sample rate (synthetic choice)
SR_OUT = 16000                          # fixed in the module: resample(..., 16000)
FRAME_LEN = 32                          # 16 kHz samples per frontend frame
HOP_IN = FRAME_LEN * SR_IN // SR_OUT    # = 16 input (8 kHz) samples per frame
WIN_IN = 128                            # lane-aligned input window per frame (>= sinc support)
PAD_LEFT = 16                           # left zero-pad so the window covers the sinc support
HIDDEN = 128                            # per-stat channels (real model: 2560 each -> 5120)
FRAME_BLOCK = 128                       # frames per grid step -> MXU M = B*FRAME_BLOCK
EPS = 1e-6


# ---------------------------------------------------------------------------
# Fused kernel: (resample ∘ frame ∘ project) matmul + ReLU + streaming stats
# pooling.  Grid axis = frame blocks (reduction); accumulators live in VMEM
# scratch; the (B, 2C) embedding is written once at the last step.
# ---------------------------------------------------------------------------
def _fused_embed_kernel(win_ref, w_ref, b_ref, o_ref, mean_ref, m2_ref, *, num_frames):
    s = pl.program_id(0)

    @pl.when(s == 0)
    def _():
        mean_ref[...] = jnp.zeros_like(mean_ref)
        m2_ref[...] = jnp.zeros_like(m2_ref)

    batch, tb, win = win_ref.shape
    c = w_ref.shape[1]

    # Collapse B*TB into the MXU M dimension: (B*TB, 128) @ (128, C), f32 acc.
    x2d = win_ref[...].reshape(batch * tb, win)
    feats = jnp.dot(x2d, w_ref[...], preferred_element_type=jnp.float32)
    feats = jnp.maximum(feats + b_ref[...], 0.0).reshape(batch, tb, c)

    # Mask zero-padded frames of the (possibly partial) last block.
    frame_idx = s * tb + lax.broadcasted_iota(jnp.int32, (1, tb, 1), 1)
    mask = (frame_idx < num_frames).astype(jnp.float32)          # (1, TB, 1)
    n_b = jnp.minimum(tb, num_frames - s * tb).astype(jnp.float32)
    n_a = (s * tb).astype(jnp.float32)
    n = n_a + n_b

    block_mean = jnp.sum(feats * mask, axis=1) / n_b             # (B, C)
    centered = (feats - block_mean.reshape(batch, 1, c)) * mask
    block_m2 = jnp.sum(centered * centered, axis=1)              # (B, C)

    # Chan/Welford streaming combine (avoids E[x^2]-mean^2 cancellation).
    delta = block_mean - mean_ref[...]
    mean_ref[...] = mean_ref[...] + delta * (n_b / n)
    m2_ref[...] = m2_ref[...] + block_m2 + delta * delta * (n_a * n_b / n)

    @pl.when(s == pl.num_programs(0) - 1)
    def _():
        var = m2_ref[...] * (1.0 / num_frames)                   # biased (1/N) variance
        std = jnp.sqrt(jnp.maximum(var, EPS))
        # cat([pool_mean, pool_std], dim=1) via direct lane-aligned slice stores.
        o_ref[:, :c] = mean_ref[...].astype(o_ref.dtype)
        o_ref[:, c:] = std.astype(o_ref.dtype)


# ---------------------------------------------------------------------------
# Fold the Kaiser-windowed-sinc resample, the non-overlapping 32-sample
# framing of the 16 kHz signal and the (FRAME_LEN, HIDDEN) frame projection
# into one (WIN_IN, HIDDEN) operator.  The resample operator satisfies
# R[i + HOP_IN, j + FRAME_LEN] == R[i, j], so a single block works for every
# frame; its support (~49 input samples) fits inside the 128-sample window.
# TODO(synk): resampy's "kaiser_best" uses a long precomputed filter table;
# this is a deterministic windowed-sinc stand-in with the same structure.
# ---------------------------------------------------------------------------
def _make_combined_weight(w, num_zeros=16, beta=14.769656459379492,
                          rolloff=0.9475937167399596):
    di = jnp.arange(WIN_IN, dtype=jnp.float32)[:, None]      # input sample inside window
    f = jnp.arange(FRAME_LEN, dtype=jnp.float32)[None, :]    # output sample inside frame
    dt = (di - PAD_LEFT) / SR_IN - f / SR_OUT
    fc = rolloff * 0.5 * min(SR_IN, SR_OUT)
    gain = 2.0 * fc / SR_IN
    xz = 2.0 * fc * dt
    z = xz / num_zeros
    kaiser = jnp.where(
        jnp.abs(z) < 1.0,
        jnp.i0(beta * jnp.sqrt(jnp.maximum(1.0 - z * z, 0.0))) / jnp.i0(jnp.float32(beta)),
        0.0,
    )
    h = gain * jnp.sinc(xz) * kaiser                          # (WIN_IN, FRAME_LEN)
    return h @ w                                              # (WIN_IN, HIDDEN), f32


def init_params(key):
    k_w, _ = jax.random.split(key)
    w = 0.1 * jax.random.normal(k_w, (FRAME_LEN, HIDDEN), jnp.float32)
    return {
        # bf16 MXU operands; accumulation and pooling stay f32 in the kernel.
        "w_combined": _make_combined_weight(w).astype(jnp.bfloat16),
        "bias": jnp.zeros((1, HIDDEN), jnp.float32),
    }


def _build_frame_windows(x, num_frames):
    """im2col framing: window t = x_pad[:, HOP_IN*t : HOP_IN*t + WIN_IN].

    Built from 8 shifted strided views (hop 16, window 128) -> no dense
    resample operator; HBM expansion is only 8x the raw audio.
    """
    b, t_in = x.shape
    needed = HOP_IN * (num_frames - 1) + WIN_IN
    pad_right = max(0, needed - (PAD_LEFT + t_in))
    x_pad = jnp.pad(x, ((0, 0), (PAD_LEFT, pad_right)))
    views = [
        x_pad[:, HOP_IN * k: HOP_IN * k + HOP_IN * num_frames].reshape(b, num_frames, HOP_IN)
        for k in range(WIN_IN // HOP_IN)
    ]
    return jnp.concatenate(views, axis=-1)                    # (B, num_frames, WIN_IN)


def pretrained_speaker_embedding_backbone(batch, params, *, frame_block=FRAME_BLOCK):
    if "signal_length" in batch:
        # Mirrors the torch module's behaviour for variable-length inputs.
        raise NotImplementedError
    signal = batch["signal"]                                  # (B, 1, T)
    x = jnp.squeeze(signal, axis=1).astype(jnp.float32)       # .squeeze(dim=1)
    b, t_in = x.shape

    t_out = (t_in * SR_OUT) // SR_IN                          # 16 kHz length
    num_frames = t_out // FRAME_LEN
    # TODO(synk): trailing (< FRAME_LEN) resampled samples are dropped, as in
    # the previous synthetic frontend; exact resampy length semantics unknown.
    num_blocks = pl.cdiv(num_frames, frame_block)
    tf_pad = num_blocks * frame_block

    windows = _build_frame_windows(x, num_frames)
    windows = jnp.pad(windows, ((0, 0), (0, tf_pad - num_frames), (0, 0)))
    windows = windows.astype(jnp.bfloat16)                    # halve HBM stream bytes

    kernel = functools.partial(_fused_embed_kernel, num_frames=num_frames)
    embedding = pl.pallas_call(
        kernel,
        out_shape=jax.ShapeDtypeStruct((b, 2 * HIDDEN), jnp.float32),
        grid_spec=pltpu.PrefetchScalarGridSpec(
            num_scalar_prefetch=0,
            grid=(num_blocks,),
            in_specs=[
                pl.BlockSpec((b, frame_block, WIN_IN), lambda s: (0, s, 0)),
                pl.BlockSpec((WIN_IN, HIDDEN), lambda s: (0, 0)),   # resident weight
                pl.BlockSpec((1, HIDDEN), lambda s: (0, 0)),        # resident bias
            ],
            out_specs=pl.BlockSpec((b, 2 * HIDDEN), lambda s: (0, 0)),
            scratch_shapes=[
                pltpu.VMEM((b, HIDDEN), jnp.float32),   # running mean
                pltpu.VMEM((b, HIDDEN), jnp.float32),   # running M2
            ],
        ),
        compiler_params=pltpu.CompilerParams(
            dimension_semantics=("arbitrary",),         # frame axis is a reduction
            vmem_limit_bytes=32 * 1024 * 1024,
        ),
    )(windows, params["w_combined"], params["bias"])

    return {"speaker_embedding": embedding}


if __name__ == "__main__":
    key = jax.random.PRNGKey(0)
    k_sig, k_params = jax.random.split(key)

    B, T = 2, 4000                                   # 0.5 s of 8 kHz audio
    signal = jax.random.normal(k_sig, (B, 1, T), dtype=jnp.float32)
    params = init_params(k_params)

    out = pretrained_speaker_embedding_backbone({"signal": signal}, params)
    emb = jax.block_until_ready(out["speaker_embedding"])

    assert emb.shape == (B, 2 * HIDDEN), emb.shape
    assert bool(jnp.all(jnp.isfinite(emb)))

    # Pure-JAX reference of the fused pipeline (same bf16 operands).
    num_frames = ((T * SR_OUT) // SR_IN) // FRAME_LEN
    win = _build_frame_windows(jnp.squeeze(signal, 1), num_frames).astype(jnp.bfloat16)
    feats = jnp.maximum(
        jnp.einsum("btk,kc->btc", win.astype(jnp.float32),
                   params["w_combined"].astype(jnp.float32)) + params["bias"],
        0.0,
    )
    ref_mean = feats.mean(axis=1)
    ref_var = jnp.mean((feats - ref_mean[:, None, :]) ** 2, axis=1)
    ref = jnp.concatenate([ref_mean, jnp.sqrt(jnp.maximum(ref_var, EPS))], axis=1)
    assert bool(jnp.allclose(emb, ref, rtol=5e-3, atol=5e-3)), (
        float(jnp.max(jnp.abs(emb - ref))))

    print("KERNEL_OK")
</pallas_src>

<mosaic_0001>
module attributes {stable_mosaic.version = 11 : i64} {
  func.func @_fused_embed_kernel(%arg0: i32, %arg1: memref<2x128x128xbf16, #tpu.memory_space<vmem>>, %arg2: memref<128x128xbf16, #tpu.memory_space<vmem>>, %arg3: memref<1x128xf32, #tpu.memory_space<vmem>>, %arg4: memref<2x256xf32, #tpu.memory_space<vmem>>, %arg5: memref<2x128xf32, #tpu.memory_space<vmem>>, %arg6: memref<2x128xf32, #tpu.memory_space<vmem>>) attributes {dimension_semantics = [#tpu.dimension_semantics<arbitrary>], iteration_bounds = array<i64: 2>, scalar_prefetch = 0 : i64, scratch_operands = 2 : i64, tpu.core_type = #tpu.core_type<tc>, window_params = [{transform_indices = @transform_0, window_bounds = array<i64: 2, 128, 128>}, {pipeline_mode = #tpu.pipeline_mode<synchronous>, transform_indices = @transform_1, window_bounds = array<i64: 128, 128>}, {pipeline_mode = #tpu.pipeline_mode<synchronous>, transform_indices = @transform_2, window_bounds = array<i64: 1, 128>}, {pipeline_mode = #tpu.pipeline_mode<synchronous>, transform_indices = @transform_3, window_bounds = array<i64: 2, 256>}]} {
    %c0_i32 = arith.constant 0 : i32
    %0 = arith.cmpi eq, %arg0, %c0_i32 : i32
    %1 = arith.extui %0 : i1 to i32
    %c0_i32_0 = arith.constant 0 : i32
    %2 = arith.cmpi ne, %1, %c0_i32_0 : i32
    scf.if %2 {
      %cst_25 = arith.constant 0.000000e+00 : f32
      %60 = vector.broadcast %cst_25 : f32 to vector<2x128xf32>
      %c0_26 = arith.constant 0 : index
      %c0_27 = arith.constant 0 : index
      %61 = vector.load %arg5[%c0_26, %c0_27] : memref<2x128xf32, #tpu.memory_space<vmem>>, vector<2x128xf32>
      tpu.vector_store %arg5[%c0_26, %c0_27], %60 {strides = array<i32>} : memref<2x128xf32, #tpu.memory_space<vmem>>, vector<2x128xf32>,
      %cst_28 = arith.constant 0.000000e+00 : f32
      %62 = vector.broadcast %cst_28 : f32 to vector<2x128xf32>
      %c0_29 = arith.constant 0 : index
      %c0_30 = arith.constant 0 : index
      %63 = vector.load %arg6[%c0_29, %c0_30] : memref<2x128xf32, #tpu.memory_space<vmem>>, vector<2x128xf32>
      tpu.vector_store %arg6[%c0_29, %c0_30], %62 {strides = array<i32>} : memref<2x128xf32, #tpu.memory_space<vmem>>, vector<2x128xf32>,
    } else {
    }
    %c0 = arith.constant 0 : index
    %c0_1 = arith.constant 0 : index
    %c0_2 = arith.constant 0 : index
    %3 = vector.load %arg1[%c0, %c0_1, %c0_2] : memref<2x128x128xbf16, #tpu.memory_space<vmem>>, vector<2x128x128xbf16>
    %4 = vector.shape_cast %3 : vector<2x128x128xbf16> to vector<256x128xbf16>
    %c0_3 = arith.constant 0 : index
    %c0_4 = arith.constant 0 : index
    %5 = vector.load %arg2[%c0_3, %c0_4] : memref<128x128xbf16, #tpu.memory_space<vmem>>, vector<128x128xbf16>
    %cst = arith.constant dense<0.000000e+00> : vector<256x128xf32>
    %6 = tpu.matmul %4, %5, %cst {dimension_numbers = #tpu.dot_dimension_numbers<[1], [0], [0], [1], [0, 0, 1, 1], [], []>} : vector<256x128xbf16>, vector<128x128xbf16>, vector<256x128xf32> -> vector<256x128xf32>
    %c0_5 = arith.constant 0 : index
    %c0_6 = arith.constant 0 : index
    %7 = vector.load %arg3[%c0_5, %c0_6] : memref<1x128xf32, #tpu.memory_space<vmem>>, vector<1x128xf32>
    %8 = vector.broadcast %7 : vector<1x128xf32> to vector<256x128xf32>
    %9 = arith.addf %6, %8 : vector<256x128xf32>
    %cst_7 = arith.constant 0.000000e+00 : f32
    %10 = vector.broadcast %cst_7 : f32 to vector<256x128xf32>
    %11 = arith.maximumf %9, %10 : vector<256x128xf32>
    %12 = vector.shape_cast %11 : vector<256x128xf32> to vector<2x128x128xf32>
    %c128_i32 = arith.constant 128 : i32
    %13 = arith.muli %arg0, %c128_i32 : i32
    %14 = tpu.iota {dimensions = array<i32: 1>} : vector<1x128x1xi32>
    %15 = vector.broadcast %13 : i32 to vector<1x128x1xi32>
    %16 = arith.addi %15, %14 : vector<1x128x1xi32>
    %c250_i32 = arith.constant 250 : i32
    %17 = vector.broadcast %c250_i32 : i32 to vector<1x128x1xi32>
    %18 = arith.cmpi slt, %16, %17 : vector<1x128x1xi32>
    %19 = arith.extui %18 : vector<1x128x1xi1> to vector<1x128x1xi32>
    %20 = arith.sitofp %19 : vector<1x128x1xi32> to vector<1x128x1xf32>
    %c128_i32_8 = arith.constant 128 : i32
    %21 = arith.muli %arg0, %c128_i32_8 : i32
    %c250_i32_9 = arith.constant 250 : i32
    %22 = arith.subi %c250_i32_9, %21 : i32
    %c128_i32_10 = arith.constant 128 : i32
    %23 = arith.minsi %c128_i32_10, %22 : i32
    %24 = arith.sitofp %23 : i32 to f32
    %c128_i32_11 = arith.constant 128 : i32
    %25 = arith.muli %arg0, %c128_i32_11 : i32
    %26 = arith.sitofp %25 : i32 to f32
    %27 = arith.addf %26, %24 : f32
    %28 = vector.broadcast %20 : vector<1x128x1xf32> to vector<2x128x128xf32>
    %29 = arith.mulf %12, %28 : vector<2x128x128xf32>
    %cst_12 = arith.constant dense<0.000000e+00> : vector<2x128xf32>
    %30 = vector.multi_reduction <add>, %29, %cst_12 [1] : vector<2x128x128xf32> to vector<2x128xf32>
    %31 = vector.broadcast %24 : f32 to vector<2x128xf32>
    %32 = arith.divf %30, %31 : vector<2x128xf32>
    %33 = vector.shape_cast %32 : vector<2x128xf32> to vector<2x1x128xf32>
    %34 = vector.broadcast %33 : vector<2x1x128xf32> to vector<2x128x128xf32>
    %35 = arith.subf %12, %34 : vector<2x128x128xf32>
    %36 = vector.broadcast %20 : vector<1x128x1xf32> to vector<2x128x128xf32>
    %37 = arith.mulf %35, %36 : vector<2x128x128xf32>
    %38 = arith.mulf %37, %37 : vector<2x128x128xf32>
    %cst_13 = arith.constant dense<0.000000e+00> : vector<2x128xf32>
    %39 = vector.multi_reduction <add>, %38, %cst_13 [1] : vector<2x128x128xf32> to vector<2x128xf32>
    %c0_14 = arith.constant 0 : index
    %c0_15 = arith.constant 0 : index
    %40 = vector.load %arg5[%c0_14, %c0_15] : memref<2x128xf32, #tpu.memory_space<vmem>>, vector<2x128xf32>
    %41 = arith.subf %32, %40 : vector<2x128xf32>
    %c0_16 = arith.constant 0 : index
    %c0_17 = arith.constant 0 : index
    %42 = vector.load %arg5[%c0_16, %c0_17] : memref<2x128xf32, #tpu.memory_space<vmem>>, vector<2x128xf32>
    %43 = arith.divf %24, %27 : f32
    %44 = vector.broadcast %43 : f32 to vector<2x128xf32>
    %45 = arith.mulf %41, %44 : vector<2x128xf32>
    %46 = arith.addf %42, %45 : vector<2x128xf32>
    %c0_18 = arith.constant 0 : index
    %c0_19 = arith.constant 0 : index
    %47 = vector.load %arg5[%c0_18, %c0_19] : memref<2x128xf32, #tpu.memory_space<vmem>>, vector<2x128xf32>
    tpu.vector_store %arg5[%c0_18, %c0_19], %46 {strides = array<i32>} : memref<2x128xf32, #tpu.memory_space<vmem>>, vector<2x128xf32>,
    %c0_20 = arith.constant 0 : index
    %c0_21 = arith.constant 0 : index
    %48 = vector.load %arg6[%c0_20, %c0_21] : memref<2x128xf32, #tpu.memory_space<vmem>>, vector<2x128xf32>
    %49 = arith.addf %48, %39 : vector<2x128xf32>
    %50 = arith.mulf %41, %41 : vector<2x128xf32>
    %51 = arith.mulf %26, %24 : f32
    %52 = arith.divf %51, %27 : f32
    %53 = vector.broadcast %52 : f32 to vector<2x128xf32>
    %54 = arith.mulf %50, %53 : vector<2x128xf32>
    %55 = arith.addf %49, %54 : vector<2x128xf32>
    %c0_22 = arith.constant 0 : index
    %c0_23 = arith.constant 0 : index
    %56 = vector.load %arg6[%c0_22, %c0_23] : memref<2x128xf32, #tpu.memory_space<vmem>>, vector<2x128xf32>
    tpu.vector_store %arg6[%c0_22, %c0_23], %55 {strides = array<i32>} : memref<2x128xf32, #tpu.memory_space<vmem>>, vector<2x128xf32>,
    %c1_i32 = arith.constant 1 : i32
    %57 = arith.cmpi eq, %arg0, %c1_i32 : i32
    %58 = arith.extui %57 : i1 to i32
    %c0_i32_24 = arith.constant 0 : i32
    %59 = arith.cmpi ne, %58, %c0_i32_24 : i32
    scf.if %59 {
      %c0_25 = arith.constant 0 : index
      %c0_26 = arith.constant 0 : index
      %60 = vector.load %arg6[%c0_25, %c0_26] : memref<2x128xf32, #tpu.memory_space<vmem>>, vector<2x128xf32>
      %cst_27 = arith.constant 4.000000e-03 : f32
      %61 = vector.broadcast %cst_27 : f32 to vector<2x128xf32>
      %62 = arith.mulf %60, %61 : vector<2x128xf32>
      %cst_28 = arith.constant 9.99999997E-7 : f32
      %63 = vector.broadcast %cst_28 : f32 to vector<2x128xf32>
      %64 = arith.maximumf %62, %63 : vector<2x128xf32>
      %65 = math.sqrt %64 : vector<2x128xf32>
      %c0_29 = arith.constant 0 : index
      %c0_30 = arith.constant 0 : index
      %66 = vector.load %arg5[%c0_29, %c0_30] : memref<2x128xf32, #tpu.memory_space<vmem>>, vector<2x128xf32>
      %c0_31 = arith.constant 0 : index
      %c0_32 = arith.constant 0 : index
      %67 = vector.load %arg4[%c0_31, %c0_32] : memref<2x256xf32, #tpu.memory_space<vmem>>, vector<2x128xf32>
      tpu.vector_store %arg4[%c0_31, %c0_32], %66 {strides = array<i32>} : memref<2x256xf32, #tpu.memory_space<vmem>>, vector<2x128xf32>,
      %c0_33 = arith.constant 0 : index
      %c128 = arith.constant 128 : index
      %68 = vector.load %arg4[%c0_33, %c128] : memref<2x256xf32, #tpu.memory_space<vmem>>, vector<2x128xf32>
      tpu.vector_store %arg4[%c0_33, %c128], %65 {strides = array<i32>} : memref<2x256xf32, #tpu.memory_space<vmem>>, vector<2x128xf32>,
    } else {
    }
    return
  }
  func.func @transform_0(%arg0: i32) -> (i32, i32, i32) {
    %c0_i32 = arith.constant 0 : i32
    %c0_i32_0 = arith.constant 0 : i32
    %c0_i32_1 = arith.constant 0 : i32
    return %c0_i32, %arg0, %c0_i32_0 : i32, i32, i32
  }
  func.func @transform_1(%arg0: i32) -> (i32, i32) {
    %c0_i32 = arith.constant 0 : i32
    %c0_i32_0 = arith.constant 0 : i32
    %c0_i32_1 = arith.constant 0 : i32
    return %c0_i32, %c0_i32_0 : i32, i32
  }
  func.func @transform_2(%arg0: i32) -> (i32, i32) {
    %c0_i32 = arith.constant 0 : i32
    %c0_i32_0 = arith.constant 0 : i32
    %c0_i32_1 = arith.constant 0 : i32
    return %c0_i32, %c0_i32_0 : i32, i32
  }
  func.func @transform_3(%arg0: i32) -> (i32, i32) {
    %c0_i32 = arith.constant 0 : i32
    %c0_i32_0 = arith.constant 0 : i32
    %c0_i32_1 = arith.constant 0 : i32
    return %c0_i32, %c0_i32_0 : i32, i32
  }
}

</mosaic_0001>

<bundles_post_ra>
// kernel: tpu_custom_call.1
= control target key start
LH: loop header
LB: loop body
LE: loop exit
PB: predicated region body
PF: predicated region fallthrough
CT: control target
= control target key end

     0   :  { %8 = vsyncpa [#allocation5], 0  ;;  %s2095_s0 = inlined_call_operand.hbm [shape: bf16[2,256,128], index: 0, kind: input, shape index: {}]   ;;  %s2096_s1 = inlined_call_operand.hbm [shape: bf16[128,128], index: 1, kind: input, shape index: {}]   ;;  %s2097_s2 = inlined_call_operand.vmem [shape: f32[1,128], index: 2, kind: input, shape index: {}]   ;;  %s2098_s3 = inlined_call_operand.hbm [shape: f32[2,256], index: 3, kind: output, shape index: {}]  }
   0x1   :  { %10 = vsyncpa [#allocation5 + $0x1], 0 }
   0x2   :  { %11 = vsyncpa [#allocation8], 0 }
   0x3   :  { %12 = vsyncpa [#allocation6], 0  ;;  %s1417_s12 = smov 0   ;;  %s1419_s13 = smov 0  }
   0x4   :  { %s1421_s14 = smov 0   ;;  %s1423_s15 = smov 0  }
   0x5 LB: > { %s1436_s16 = sadd.s32 4294967295, %s1383_s15   ;;  %s1439_s17 = sadd.s32 1, %s1383_s15   ;;  %s1383_s15 = sphi %s1423_s15, %s2191_s15   ;;  %s1379_s14 = sphi %s1421_s14, %s2190_s14   ;;  %s1375_s13 = sphi %s1419_s13, %s2189_s13   ;;  %s1371_s12 = sphi %s1417_s12, %s2188_s12  }
   0x6   : > { %s22_s18 = ssub.s32 %s1383_s15, %s1439_s17  ;;  %s25_s19 = sadd.s32 1, %s1379_s14 }
   0x7   : > { %p23_p0 = scmp.eq.s32.totalorder %s22_s18, 0  ;;  %p32_p1 = scmp.ne.s32.totalorder %s1379_s14, %s1375_s13 }
   0x8   : > { %p33_p2 = scmp.eq.s32.totalorder %s1383_s15, 0  ;;  %p38_p3 = scmp.ne.s32.totalorder %s1375_s13, %s1371_s12 }
   0x9   : > { %s1449_s20 = scalar_select %p23_p0, %s1379_s14, %s25_s19  }
   0xa   : > { %p1451_p4 = por %p33_p2, %p32_p1  ;;  %p39_p5 = scmp.eq.s32.totalorder %s1436_s16, 0 }
   0xb   : > { %p1026_p6 = scmp.ge.s32.totalorder %s1383_s15, 1  ;;  %p112_p7 = scmp.lt.s32.totalorder %s1383_s15, 3 }
   0xc   : > { %p1460_p8 = por %p39_p5, %p38_p3  ;;  %p1027_p9 = scmp.ne.s32.totalorder %s1436_s16, 0 }
   0xd   : > { %p1465_p10 = pnand %p1026_p6, %p112_p7  ;;  %s123_s26 = sshll.u32 %s2096_s1, 4  ;;  %s124_s26 = int_to_ptr.hbm [resolvable:$true] %s123_s26 }
   0xe   : > { %s1385_s27 = smov [#allocation7]   ;;  %s1386_s29 = smov 64  }
   0xf   : > { %p1224_p11 = pneg %p1465_p10  ;;  %s125_s28 = sshll.u32 %s1385_s27, 4  ;;  %s126_s28 = int_to_ptr.vmem [resolvable:$true] %s125_s28 }
  0x10   : > { %s1387_s30 = smov 4   ;;  %p1028_p13 = scmp.ge.s32.totalorder %s1383_s15, 2 }
  0x11   : > { %p1225_p12 = pnand %p1224_p11, %p39_p5 }
  0x12   : > { %138 = sbr.rel (%p1028_p13) target bundleno = 37 (0x25), region = 24 }
  0x13   : > { %1227 = dma.hbm_to_vmem [thread:$0]  (!%p1225_p12), %s124_s26, 1024, %s126_s28, [#allocation8], %s1386_s29, %s1386_s29, %s1387_s30  }
  0x17   : > { %s142_s4 = sand.u32 1, %s1379_s14   ;;  %s1156_s5 = sshll.u32 %s1383_s15, 6 }
  0x18   : > { %s1029_s6 = sshll.u32 %s142_s4, 7  ;;  %s151_s9 = scalar_lea.hbm %s2095_s0, %s1156_s5 }
  0x19   : > { %s1209_s10 = scalar_select %p1451_p4, [#allocation0], [#allocation12] }
  0x1a   : > { %s164_s11 = sshll.u32 %s151_s9, 4  ;;  %s146_s12 = scalar_lea.vmem [#allocation4], %s1029_s6  ;;  %s165_s11 = int_to_ptr.hbm [resolvable:$true] %s164_s11 }
  0x1b   : > { %s166_s18 = sshll.u32 %s146_s12, 4  ;;  %s156_s19 = sld [smem:[%s1209_s10]]   ;;  %s167_s18 = int_to_ptr.vmem [resolvable:$true] %s166_s18 }
  0x1c   : > { %s1388_s24 = smov 2048   ;;  %s1389_s15 = smov 1024  }
  0x1d   : > { %1210 = sst [smem:[#allocation11]] (%p1451_p4), %s1388_s24  ;;  %s1390_s25 = smov 16  }
  0x1e   : > { %1211 = sst [smem:[#allocation11 + $0x1]] (%p1451_p4), %s1389_s15  ;;  %s1391_s26 = smov 64  }
  0x1f   : > { %1212 = sst [smem:[#allocation11 + $0x2]] (%p1451_p4), %s1390_s25  ;;  %s1392_s29 = smov 4  }
  0x20   : > { %1213 = sst [smem:[#allocation11 + $0x3]] (%p1451_p4), %s1391_s26  ;;  %s143_s30 = scalar_lea.sflag [#allocation5], %s142_s4 }
  0x21   : > { %s1032_s27 = sshll.u32 %s156_s19, 26  ;;  %1214 = sst [smem:[#allocation11 + $0x4]] (%p1451_p4), %s1391_s26 }
  0x22   : > { %s1033_s28 = sadd.s32 134217728, %s1032_s27  ;;  %1215 = sst [smem:[#allocation11 + $0x5]] (%p1451_p4), %s1392_s29 }
  0x23   : > { %s1393_s5 = smov [#allocation10]  }
  0x24   : > { %1216 = dma.general (%p1451_p4), %s165_s11, 2048, %s167_s18, %s143_s30, %s1393_s5, [#allocation11], %s1033_s28, 0  }
  0x25 PF: > { %191 = sbr.rel (%p1465_p10) target bundleno = 415 (0x19f), region = 32 }
  0x2a   : > { %s193_s6 = sand.u32 1, %s1375_s13  }
  0x2b   : > { %s1035_s7 = sshll.u32 %s193_s6, 7  ;;  %s194_s8 = scalar_lea.sflag [#allocation5], %s193_s6 }
  0x2c   : > { %s1501_s9 = scalar_lea.vmem [#allocation4], %s1035_s7 }
  0x2d   : > { %1358 = dma.done.wait (%p1460_p8), %s194_s8, 2048  }
  0x2e   : > { %1360 = vsyncadd (%p1460_p8), %s194_s8, 4294965248 }
  0x2f   : > { %1362 = dma.done.wait (%p39_p5), [#allocation8], 1024  }
  0x30   : > { %1364 = vsyncadd (%p39_p5), [#allocation8], 4294966272  ;;  %225 = sbr.rel (%p1027_p9) target bundleno = 56 (0x38), region = 44 }
  0x35   : > { %v1394_v0 = vmov 0.0  }
  0x36   : > { %226 = vst [vmem:[#allocation2] sm:$0x3] %v1394_v0 }
  0x37   : > { %227 = vst [vmem:[#allocation3] sm:$0x3] %v1394_v0 }
  0x38 PF: > { %v1180_v1 = vld [vmem:[#allocation7 + $0x38] sm:$0xff]  ;;  %v1179_v2 = vld [vmem:[#allocation7 + $0x30] sm:$0xff]  ;;  %v1178_v3 = vld [vmem:[#allocation7 + $0x28] sm:$0xff]  ;;  %s1530_s21 = sshll.u32 %s1436_s16, 7  ;;  %v546_v46 = vlaneseq  ;;  %p1151_p1 = scmp.ne.s32.totalorder %s1436_s16, 1 }
  0x39   : > { %424 = vmatpush.bf16.msra.mxu0 %v1180_v1  ;;  %1182 = vmatpush.bf16.msra.mxu2 %v1180_v1  ;;  %v1177_v4 = vld [vmem:[#allocation7 + $0x20] sm:$0xff]  ;;  %v1176_v5 = vld [vmem:[#allocation7 + $0x18] sm:$0xff]  ;;  %v1175_v6 = vld [vmem:[#allocation7 + $0x10] sm:$0xff]  ;;  %s628_s22 = ssub.s32 250, %s1530_s21  ;;  %s632_s4 = scvt.s32.f32 %s1530_s21  ;;  %v1554_v51 = vstv %s1530_s21 }
  0x3a   : > { %1183 = vmatpush.bf16.msra.mxu3 %v1180_v1  ;;  %1181 = vmatpush.bf16.msra.mxu1 %v1180_v1  ;;  %v1174_v7 = vld [vmem:[#allocation7 + $0x8] sm:$0xff]  ;;  %v1173_v8 = vld [vmem:[#allocation7] sm:$0xff]  ;;  %v1159_v17 = vld [vmem:[%s1501_s9 + $0x10] sm:$0xff]  ;;  %p629_p0 = scmp.lt.s32.totalorder %s628_s22, 128  ;;  %v1547_v47 = vshrl.u32 %v546_v46, 7 }
  0x3b   : > { %v1157_v9 = vld [vmem:[%s1501_s9] sm:$0xff]  ;;  %v1158_v13 = vld [vmem:[%s1501_s9 + $0x8] sm:$0xff]  ;;  %v1167_v18 = vld [vmem:[%s1501_s9 + $0x50] sm:$0xff] }
  0x3c   : > { %v1165_v10 = vld [vmem:[%s1501_s9 + $0x40] sm:$0xff]  ;;  %v1166_v14 = vld [vmem:[%s1501_s9 + $0x48] sm:$0xff]  ;;  %v1171_v19 = vld [vmem:[%s1501_s9 + $0x70] sm:$0xff]  ;;  %s2193_s22 = smov (!%p629_p0, %s628_s22), 128  ;;  %v548_v52 = vadd.s32 8, %v1547_v47  ;;  %v555_v53 = vadd.s32 64, %v1547_v47  ;;  %v564_v55 = vadd.s32 %v1554_v51, %v1547_v47 }
  0x3d   : > { %425 = vmatpush.bf16.msra.mxu0 %v1179_v2  ;;  %1185 = vmatpush.bf16.msra.mxu2 %v1179_v2  ;;  %v1169_v11 = vld [vmem:[%s1501_s9 + $0x60] sm:$0xff]  ;;  %v1170_v15 = vld [vmem:[%s1501_s9 + $0x68] sm:$0xff]  ;;  %v1163_v20 = vld [vmem:[%s1501_s9 + $0x30] sm:$0xff]  ;;  %s1533_s23 = scvt.s32.f32 %s2193_s22  ;;  %v549_v56 = vadd.s32 16, %v1547_v47  ;;  %v556_v57 = vadd.s32 72, %v1547_v47  ;;  %v550_v60 = vadd.s32 24, %v1547_v47 }
  0x3e   : > { %1186 = vmatpush.bf16.msra.mxu3 %v1179_v2  ;;  %1184 = vmatpush.bf16.msra.mxu1 %v1179_v2  ;;  %v1161_v12 = vld [vmem:[%s1501_s9 + $0x20] sm:$0xff]  ;;  %v1162_v16 = vld [vmem:[%s1501_s9 + $0x28] sm:$0xff]  ;;  %v1160_v21 = vld [vmem:[%s1501_s9 + $0x18] sm:$0xff]  ;;  %v565_v58 = vadd.s32 %v1554_v51, %v548_v52  ;;  %v572_v59 = vadd.s32 %v1554_v51, %v555_v53  ;;  %v557_v63 = vadd.s32 80, %v1547_v47  ;;  %v551_v0 = vadd.s32 32, %v1547_v47 }
  0x3f   : > { %v1168_v22 = vld [vmem:[%s1501_s9 + $0x58] sm:$0xff]  ;;  %s633_s10 = sadd.f32 %s632_s4, %s1533_s23  ;;  %vm580_vm4 = vcmp.lt.s32.totalorder %v564_v55, 250  ;;  %v566_v2 = vadd.s32 %v1554_v51, %v549_v56  ;;  %s906_s24 = smul.f32 %s632_s4, %s1533_s23 }
  0x40   : > { %v1172_v23 = vld [vmem:[%s1501_s9 + $0x78] sm:$0xff]  ;;  %vm581_vm5 = vcmp.lt.s32.totalorder %v565_v58, 250  ;;  %vm588_vm6 = vcmp.lt.s32.totalorder %v572_v59, 250 }
  0x41   : > { %426 = vmatpush.bf16.msra.mxu0 %v1178_v3  ;;  %1188 = vmatpush.bf16.msra.mxu2 %v1178_v3  ;;  %v1164_v24 = vld [vmem:[%s1501_s9 + $0x38] sm:$0xff]  ;;  %v870_v25 = vstv %s633_s10  ;;  %vm582_vm7 = vcmp.lt.s32.totalorder %v566_v2, 250 }
  0x42   : > { %1189 = vmatpush.bf16.msra.mxu3 %v1178_v3  ;;  %1187 = vmatpush.bf16.msra.mxu1 %v1178_v3  ;;  %1277 = vrcp.f32 %v870_v25  ;;  %vm876_vm0 = vweird.f32 %v870_v25  ;;  %v882_v36 = vand.u32 2147483648, %v870_v25  ;;  %v880_v39 = vand.u32 2147483647, %v870_v25  ;;  %v1572_v62 = vld [vmem:[%s2097_s2] ss:$0 sm:$0xff] }
  0x43   : > { %v573_v3 = vadd.s32 %v1554_v51, %v556_v57 }
  0x44   : > { %v883_v40 = vor.u32 1.1754944e-38, %v882_v36  ;;  %vm881_vm3 = vcmp.eq.f32.partialorder %v880_v39, 8.507059e+37  ;;  %v553_v39 = vadd.s32 48, %v1547_v47 }
  0x45   : > { %427 = vmatpush.bf16.msra.mxu0 %v1177_v4  ;;  %1191 = vmatpush.bf16.msra.mxu2 %v1177_v4  ;;  %vm589_vm8 = vcmp.lt.s32.totalorder %v573_v3, 250 }
  0x46   : > { %1192 = vmatpush.bf16.msra.mxu3 %v1177_v4  ;;  %1190 = vmatpush.bf16.msra.mxu1 %v1177_v4  ;;  %v558_v4 = vadd.s32 88, %v1547_v47  ;;  %v570_v2 = vadd.s32 %v1554_v51, %v553_v39 }
  0x48   : > { %v1278_v27 = vpop.eup %1277  ;;  %vm586_vm14 = vcmp.lt.s32.totalorder %v570_v2, 250 }
  0x49   : > { %428 = vmatpush.bf16.msra.mxu0 %v1176_v5  ;;  %1194 = vmatpush.bf16.msra.mxu2 %v1176_v5  ;;  %v872_v29 = vmul.f32 %v1278_v27, %v870_v25  ;;  %vm877_vm1 = vweird.f32 %v1278_v27 }
  0x4a   : > { %1195 = vmatpush.bf16.msra.mxu3 %v1176_v5  ;;  %1193 = vmatpush.bf16.msra.mxu1 %v1176_v5  ;;  %vm878_vm2 = vmor %vm876_vm0, %vm877_vm1 }
  0x4b   : > { %v873_v30 = vsub.f32 1.0, %v872_v29 }
  0x4d   : > { %429 = vmatpush.bf16.msra.mxu0 %v1175_v6  ;;  %1197 = vmatpush.bf16.msra.mxu2 %v1175_v6  ;;  %v874_v32 = vmul.f32 %v1278_v27, %v873_v30 }
  0x4e   : > { %1198 = vmatpush.bf16.msra.mxu3 %v1175_v6  ;;  %1196 = vmatpush.bf16.msra.mxu1 %v1175_v6  ;;  %v567_v6 = vadd.s32 %v1554_v51, %v550_v60  ;;  %v554_v60 = vadd.s32 56, %v1547_v47 }
  0x4f   : > { %v875_v35 = vadd.f32 %v1278_v27, %v874_v32 }
  0x50   : > { %vm583_vm9 = vcmp.lt.s32.totalorder %v567_v6, 250  ;;  %v559_v6 = vadd.s32 96, %v1547_v47 }
  0x51   : > { %430 = vmatpush.bf16.msra.mxu0 %v1174_v7  ;;  %1200 = vmatpush.bf16.msra.mxu2 %v1174_v7  ;;  %v879_v38 = vsel %vm878_vm2, %v1278_v27, %v875_v35 }
  0x52   : > { %1201 = vmatpush.bf16.msra.mxu3 %v1174_v7  ;;  %1199 = vmatpush.bf16.msra.mxu1 %v1174_v7  ;;  %v884_v42 = vsel %vm881_vm3, %v883_v40, %v879_v38 }
  0x53   : > { %1205 = vpush %v884_v42 }
  0x55   : > { %431 = vmatpush.bf16.msra.mxu0 %v1173_v8  ;;  %1203 = vmatpush.bf16.msra.mxu2 %v1173_v8 }
  0x56   : > { %1204 = vmatpush.bf16.msra.mxu3 %v1173_v8  ;;  %1202 = vmatpush.bf16.msra.mxu1 %v1173_v8  ;;  %v574_v8 = vadd.s32 %v1554_v51, %v557_v63 }
  0x58   : > { %432 = vmatmul.bf16.vlgmr.msra.gmra.mxu0 %v1157_v9  ;;  %472 = vmatmul.bf16.vlgmr.msra.gmra.mxu2 %v1165_v10  ;;  %v568_v9 = vadd.s32 %v1554_v51, %v551_v0  ;;  %v552_v10 = vadd.s32 40, %v1547_v47  ;;  %vm590_vm10 = vcmp.lt.s32.totalorder %v574_v8, 250 }
  0x59   : > { %492 = vmatmul.bf16.vlgmr.msra.gmra.mxu3 %v1169_v11  ;;  %452 = vmatmul.bf16.vlgmr.msra.gmra.mxu1 %v1161_v12  ;;  %v2110_v11 = vmov 0.0  }
  0x5a   : > { %v1589_v12 = vsel %vm580_vm4, 1.0, %v2110_v11  ;;  %vm584_vm11 = vcmp.lt.s32.totalorder %v568_v9, 250  ;;  %v1622_v27 = vsel %vm589_vm8, 1.0, %v2110_v11  ;;  %vm893_vm8 = vcmask 1041409  }
  0x5b   : > { %v1641_v35 = vsel %vm584_vm11, 1.0, %v2110_v11 }
  0x68   : > { %437 = vmatmul.bf16.gmra.mxu0 %v1158_v13  ;;  %477 = vmatmul.bf16.gmra.mxu2 %v1166_v14 }
  0x69   : > { %497 = vmatmul.bf16.gmra.mxu3 %v1170_v15  ;;  %457 = vmatmul.bf16.gmra.mxu1 %v1162_v16 }
  0x78   : > { %442 = vmatmul.bf16.gmra.mxu0 %v1159_v17  ;;  %482 = vmatmul.bf16.gmra.mxu2 %v1167_v18  ;;  %v575_v17 = vadd.s32 %v1554_v51, %v558_v4 }
  0x79   : > { %502 = vmatmul.bf16.gmra.mxu3 %v1171_v19  ;;  %462 = vmatmul.bf16.gmra.mxu1 %v1163_v20  ;;  %v1608_v19 = vsel %vm581_vm5, 1.0, %v2110_v11  ;;  %v1612_v20 = vsel %vm588_vm6, 1.0, %v2110_v11 }
  0x7a   : > { %vm591_vm12 = vcmp.lt.s32.totalorder %v575_v17, 250 }
  0x7b   : > { %v1665_v46 = vsel %vm591_vm12, 1.0, %v2110_v11 }
  0x84   : > { %s1978_s18 = spop %1205 }
  0x85   : > { %s886_s19 = smul.f32 %s1978_s18, %s1533_s23 }
  0x86   : > { %s923_s15 = smul.f32 %s1978_s18, %s906_s24 }
  0x88   : > { %447 = vmatmul.bf16.gmra.mxu0 %v1160_v21  ;;  %487 = vmatmul.bf16.gmra.mxu2 %v1168_v22 }
  0x89   : > { %507 = vmatmul.bf16.gmra.mxu3 %v1172_v23  ;;  %467 = vmatmul.bf16.gmra.mxu1 %v1164_v24  ;;  %v569_v23 = vadd.s32 %v1554_v51, %v552_v10 }
  0x8b   : > { %vm585_vm13 = vcmp.lt.s32.totalorder %v569_v23, 250 }
  0x8c   : > { %v1685_v57 = vsel %vm585_vm13, 1.0, %v2110_v11 }
  0xd5   : > { %v433_v26 = vpop.f32.mrf.mxu0 }
  0xd6   : > { %v453_v28 = vpop.f32.mrf.mxu1  ;;  %v1583_v7 = vadd.f32 %v1572_v62, %v433_v26  ;;  %v1619_v26 = vsel %vm582_vm7, 1.0, %v2110_v11 }
  0xd7   : > { %v1595_v14 = vadd.f32 %v1572_v62, %v453_v28 }
  0xd8   : > { %v2108_v22 = vmax.f32 %v1583_v7, 0.0 }
  0xd9   : > { %v2102_v25 = vmax.f32 %v1595_v14, 0.0 }
  0xda   : > { %v634_v36 = vmul.f32 %v1589_v12, %v2108_v22 }
  0xdb   : > { %v473_v31 = vpop.f32.mrf.mxu2  ;;  %v1658_v42 = vmul.f32 %v1612_v20, %v2102_v25 }
  0xdc   : > { %v493_v33 = vpop.f32.mrf.mxu3  ;;  %v1592_v13 = vadd.f32 %v1572_v62, %v473_v31 }
  0xdd   : > { %v435_v34 = vpop.f32.mrf.mxu0  ;;  %v1600_v16 = vadd.f32 %v1572_v62, %v493_v33  ;;  %v1635_v33 = vsel %vm583_vm9, 1.0, %v2110_v11 }
  0xde   : > { %v1539_v37 = vpop.f32.mrf.mxu1  ;;  %v1604_v18 = vadd.f32 %v1572_v62, %v435_v34  ;;  %v2100_v24 = vmax.f32 %v1592_v13, 0.0  ;;  %v1638_v34 = vsel %vm590_vm10, 1.0, %v2110_v11 }
  0xdf   : > { %2134 = vst [vmem:[#allocation16_spill] sm:$0xff] %v1600_v16  ;;  %v2099_v29 = vmax.f32 %v1600_v16, 0.0  ;;  %v1630_v31 = vadd.f32 %v1572_v62, %v1539_v37  ;;  %v2139_v16 = vmov 0.0  }
  0xe0   : > { %v2107_v32 = vmax.f32 %v1604_v18, 0.0  ;;  %v650_v40 = vmul.f32 %v1589_v12, %v2100_v24 }
  0xe1   : > { %v2101_v53 = vmax.f32 %v1630_v31, 0.0 }
  0xe3   : > { %v1541_v41 = vpop.f32.mrf.mxu2  ;;  %v1714_v10 = vmul.f32 %v1622_v27, %v2101_v53 }
  0xe4   : > { %v1543_v43 = vpop.f32.mrf.mxu3 }
  0xe5   : > { %v438_v44 = vpop.f32.mrf.mxu0  ;;  %v1701_v3 = vadd.f32 %v1572_v62, %v1543_v43 }
  0xe6   : > { %v1545_v45 = vpop.f32.mrf.mxu1  ;;  %v1626_v30 = vadd.f32 %v1572_v62, %v438_v44  ;;  %v1662_v44 = vadd.f32 %v1572_v62, %v1541_v41  ;;  %v635_v41 = vmul.f32 %v1608_v19, %v2107_v32 }
  0xe8   : > { %v2105_v52 = vmax.f32 %v1626_v30, 0.0  ;;  %v666_v23 = vadd.f32 %v635_v41, %v634_v36  ;;  %v1763_v41 = vadd.f32 %v1572_v62, %v1545_v45 }
  0xea   : > { %v636_v9 = vmul.f32 %v1619_v26, %v2105_v52  ;;  %v1749_v52 = vsel %vm586_vm14, 1.0, %v2110_v11 }
  0xeb   : > { %v1549_v48 = vpop.f32.mrf.mxu2 }
  0xec   : > { %v1551_v49 = vpop.f32.mrf.mxu3  ;;  %v1682_v56 = vadd.f32 %v1572_v62, %v1549_v48  ;;  %v2104_v48 = vmax.f32 %v1662_v44, 0.0  ;;  %v667_v53 = vadd.f32 %v666_v23, %v636_v9 }
  0xed   : > { %v440_v50 = vpop.f32.mrf.mxu0 }
  0xee   : > { %v1558_v54 = vpop.f32.mrf.mxu1  ;;  %v1647_v37 = vadd.f32 %v1572_v62, %v440_v50  ;;  %v1670_v50 = vmul.f32 %v1612_v20, %v2099_v29  ;;  %2135 = vst [vmem:[#allocation17_spill] sm:$0xff] %v1682_v56  ;;  %v651_v36 = vmul.f32 %v1608_v19, %v2104_v48 }
  0xf0   : > { %v2103_v63 = vmax.f32 %v1647_v37, 0.0 }
  0xf2   : > { %v637_v39 = vmul.f32 %v1635_v33, %v2103_v63 }
  0xf3   : > { %v1567_v61 = vpop.f32.mrf.mxu2 }
  0xf4   : > { %v1579_v5 = vpop.f32.mrf.mxu3  ;;  %v1705_v4 = vadd.f32 %v1572_v62, %v1567_v61  ;;  %v2109_v61 = vmax.f32 %v1682_v56, 0.0  ;;  %v668_v23 = vadd.f32 %v667_v53, %v637_v39  ;;  %v562_v56 = vadd.s32 120, %v1547_v47 }
  0xf5   : > { %v443_v1 = vpop.f32.mrf.mxu0 }
  0xf6   : > { %v1597_v15 = vpop.f32.mrf.mxu1  ;;  %v1675_v55 = vadd.f32 %v1572_v62, %v443_v1  ;;  %v1695_v1 = vstv %s1533_s23  ;;  %2136 = vst [vmem:[#allocation18_spill] sm:$0xff] %v1705_v4  ;;  %v652_v48 = vmul.f32 %v1619_v26, %v2109_v61  ;;  %v687_v61 = vadd.f32 %v651_v36, %v650_v40 }
  0xf7   : > { %1279 = vrcp.f32 %v1695_v1  ;;  %vm714_vm4 = vweird.f32 %v1695_v1 }
  0xf8   : > { %v2106_v17 = vmax.f32 %v1675_v55, 0.0  ;;  %v688_v36 = vadd.f32 %v687_v61, %v652_v48  ;;  %v1789_v48 = vadd.f32 %v1572_v62, %v1551_v49  ;;  %v1793_v61 = vadd.f32 %v1572_v62, %v1558_v54 }
  0xf9   : > { %v1807_v49 = vadd.f32 %v1572_v62, %v1597_v15 }
  0xfa   : > { %v638_v25 = vmul.f32 %v1641_v35, %v2106_v17  ;;  %2141 = vst [vmem:[#allocation21_spill] sm:$0xff] %v1789_v48 }
  0xfb   : > { %v483_v21 = vpop.f32.mrf.mxu2 }
  0xfc   : > { %v1649_v38 = vpop.f32.mrf.mxu3  ;;  %v1727_v29 = vadd.f32 %v1572_v62, %v483_v21  ;;  %v669_v11 = vadd.f32 %v668_v23, %v638_v25 }
  0xfd   : > { %v445_v28 = vpop.f32.mrf.mxu0  ;;  %v1759_v22 = vpop.eup %1279 }
  0xfe   : > { %v1687_v59 = vpop.f32.mrf.mxu1  ;;  %v1692_v0 = vadd.f32 %v1572_v62, %v445_v28  ;;  %v571_v28 = vadd.s32 %v1554_v51, %v554_v60  ;;  %2137 = vst [vmem:[#allocation19_spill] sm:$0xff] %v1727_v29  ;;  %v576_v60 = vadd.s32 %v1554_v51, %v559_v6  ;;  %v560_v6 = vadd.s32 104, %v1547_v47 }
  0xff   : > { %v2140_v25 = vmax.f32 %v1727_v29, 0.0  ;;  %v2122_v29 = vmax.f32 %v1793_v61, 0.0  ;;  %vm715_vm5 = vweird.f32 %v1759_v22 }
 0x100   : > { %v2112_v24 = vmax.f32 %v1692_v0, 0.0  ;;  %vm587_vm15 = vcmp.lt.s32.totalorder %v571_v28, 250  ;;  %vm592_vm0 = vcmp.lt.s32.totalorder %v576_v60, 250  ;;  %v577_v45 = vadd.s32 %v1554_v51, %v560_v6  ;;  %vm716_vm6 = vmor %vm714_vm4, %vm715_vm5 }
 0x101   : > { %v654_v23 = vmul.f32 %v1641_v35, %v2140_v25  ;;  %v1797_v28 = vsel %vm592_vm0, 1.0, %v2139_v16 }
 0x102   : > { %vm593_vm1 = vcmp.lt.s32.totalorder %v577_v45, 250  ;;  %v1850_v45 = vadd.f32 %v1572_v62, %v1649_v38  ;;  %v710_v38 = vmul.f32 %v1759_v22, %v1695_v1 }
 0x103   : > { %v485_v58 = vpop.f32.mrf.mxu2 }
 0x104   : > { %v1740_v21 = vadd.f32 %v1572_v62, %v485_v58  ;;  %v1743_v63 = vpop.f32.mrf.mxu3  ;;  %v639_v58 = vmul.f32 %v1685_v57, %v2112_v24 }
 0x105   : > { %v448_v8 = vpop.f32.mrf.mxu0 }
 0x106   : > { %v1718_v43 = vadd.f32 %v1572_v62, %v448_v8  ;;  %v2115_v8 = vmax.f32 %v1705_v4, 0.0  ;;  %2138 = vst [vmem:[#allocation20_spill] sm:$0xff] %v1740_v21  ;;  %v468_v17 = vpop.f32.mrf.mxu1  ;;  %v1778_v4 = vsel %vm587_vm15, 1.0, %v2139_v16  ;;  %v670_v24 = vadd.f32 %v669_v11, %v639_v58 }
 0x107   : > { %v2142_v11 = vmax.f32 %v1740_v21, 0.0  ;;  %v2144_v21 = vmax.f32 %v1763_v41, 0.0 }
 0x108   : > { %v2117_v2 = vmax.f32 %v1718_v43, 0.0  ;;  %v653_v53 = vmul.f32 %v1635_v33, %v2115_v8  ;;  %v561_v8 = vadd.s32 112, %v1547_v47  ;;  %v1826_v47 = vadd.f32 %v1572_v62, %v468_v17 }
 0x109   : > { %v655_v58 = vmul.f32 %v1685_v57, %v2142_v11  ;;  %v644_v15 = vmul.f32 %v1638_v34, %v2144_v21  ;;  %v2123_v21 = vmax.f32 %v1807_v49, 0.0 }
 0x10a   : > { %v689_v6 = vadd.f32 %v688_v36, %v653_v53  ;;  %v578_v54 = vadd.s32 %v1554_v51, %v561_v8  ;;  %v1823_v8 = vadd.f32 %v1572_v62, %v1687_v59  ;;  %v1838_v59 = vsel %vm593_vm1, 1.0, %v2139_v16 }
 0x10b   : > { %v488_v9 = vpop.f32.mrf.mxu2 }
 0x10c   : > { %v1757_v32 = vadd.f32 %v1572_v62, %v488_v9  ;;  %v640_v9 = vmul.f32 %v1749_v52, %v2117_v2  ;;  %v690_v53 = vadd.f32 %v689_v6, %v654_v23  ;;  %vm594_vm2 = vcmp.lt.s32.totalorder %v578_v54, 250 }
 0x10d   : > { %v450_v39 = vpop.f32.mrf.mxu0  ;;  %v2124_v54 = vmax.f32 %v1823_v8, 0.0 }
 0x10e   : > { %v1773_v40 = vadd.f32 %v1572_v62, %v450_v39  ;;  %v671_v25 = vadd.f32 %v670_v24, %v640_v9  ;;  %v2143_v36 = vmax.f32 %v1757_v32, 0.0  ;;  %v470_v17 = vpop.f32.mrf.mxu1 }
 0x110   : > { %v2118_v2 = vmax.f32 %v1773_v40, 0.0  ;;  %v656_v11 = vmul.f32 %v1749_v52, %v2143_v36 }
 0x112   : > { %v641_v39 = vmul.f32 %v1778_v4, %v2118_v2  ;;  %v508_v2 = vpop.f32.mrf.mxu3 }
 0x113   : > { %v490_v60 = vpop.f32.mrf.mxu2 }
 0x114   : > { %v672_v24 = vadd.f32 %v671_v25, %v641_v39  ;;  %v1815_v9 = vadd.f32 %v1572_v62, %v490_v60  ;;  %v691_v39 = vadd.f32 %v690_v53, %v655_v58  ;;  %v1833_v60 = vadd.f32 %v1572_v62, %v1579_v5 }
 0x115   : > { %v579_v58 = vadd.s32 %v1554_v51, %v562_v56  ;;  %v645_v5 = vmul.f32 %v1665_v46, %v2122_v29  ;;  %v2126_v53 = vmax.f32 %v1826_v47, 0.0  ;;  %v2145_v51 = vmax.f32 %v1701_v3, 0.0 }
 0x116   : > { %v673_v6 = vadd.f32 %v672_v24, %v1658_v42  ;;  %v2121_v25 = vmax.f32 %v1815_v9, 0.0  ;;  %v692_v36 = vadd.f32 %v691_v39, %v656_v11  ;;  %v1858_v39 = vadd.f32 %v1572_v62, %v470_v17 }
 0x117   : > { %v659_v56 = vmul.f32 %v1622_v27, %v2145_v51  ;;  %vm595_vm3 = vcmp.lt.s32.totalorder %v579_v58, 250  ;;  %v647_v29 = vmul.f32 %v1838_v59, %v2124_v54 }
 0x118   : > { %v674_v23 = vadd.f32 %v673_v6, %v1714_v10  ;;  %v657_v42 = vmul.f32 %v1778_v4, %v2121_v25  ;;  %v1855_v10 = vsel %vm594_vm2, 1.0, %v2139_v16 }
 0x11a   : > { %v675_v11 = vadd.f32 %v674_v23, %v644_v15  ;;  %v693_v24 = vadd.f32 %v692_v36, %v657_v42  ;;  %v646_v15 = vmul.f32 %v1797_v28, %v2123_v21  ;;  %v1871_v23 = vadd.f32 %v1572_v62, %v1743_v63  ;;  %v510_v58 = vpop.f32.mrf.mxu3 }
 0x11b   : > { %v2146_v42 = vmax.f32 %v1789_v48, 0.0  ;;  %v648_v21 = vmul.f32 %v1855_v10, %v2126_v53 }
 0x11c   : > { %v676_v36 = vadd.f32 %v675_v11, %v645_v5  ;;  %v694_v17 = vadd.f32 %v693_v24, %v1670_v50  ;;  %v1885_v5 = vadd.f32 %v1572_v62, %v508_v2  ;;  %v2129_v50 = vmax.f32 %v1858_v39, 0.0 }
 0x11d   : > { %v660_v51 = vmul.f32 %v1638_v34, %v2146_v42  ;;  %v711_v11 = vsub.f32 1.0, %v710_v38  ;;  %v1889_v24 = vsel %vm595_vm3, 1.0, %v2139_v16  ;;  %v2148_v42 = vmax.f32 %v1833_v60, 0.0 }
 0x11e   : > { %v677_v63 = vadd.f32 %v676_v36, %v646_v15  ;;  %v695_v6 = vadd.f32 %v694_v17, %v659_v56  ;;  %2147 = vst [vmem:[#allocation22_spill] sm:$0xff] %v1885_v5  ;;  %v2128_v25 = vmax.f32 %v1871_v23, 0.0  ;;  %v2149_v56 = vmax.f32 %v1850_v45, 0.0 }
 0x11f   : > { %v661_v54 = vmul.f32 %v1665_v46, %v2148_v42  ;;  %v1899_v15 = vadd.f32 %v1572_v62, %v510_v58  ;;  %v2127_v38 = vmax.f32 %v1885_v5, 0.0  ;;  %v649_v17 = vmul.f32 %v1889_v24, %v2129_v50 }
 0x120   : > { %v678_v48 = vadd.f32 %v677_v63, %v647_v29  ;;  %v696_v53 = vadd.f32 %v695_v6, %v660_v51  ;;  %v662_v2 = vmul.f32 %v1797_v28, %v2149_v56  ;;  %v712_v42 = vmul.f32 %v1759_v22, %v711_v11 }
 0x121   : > { %v663_v29 = vmul.f32 %v1838_v59, %v2128_v25  ;;  %v544_v62 = vmax.f32 %v1899_v15, 0.0  ;;  %v718_v58 = vand.u32 2147483647, %v1695_v1 }
 0x122   : > { %v679_v36 = vadd.f32 %v678_v48, %v648_v21  ;;  %v697_v16 = vadd.f32 %v696_v53, %v661_v54  ;;  %v664_v48 = vmul.f32 %v1855_v10, %v2127_v38  ;;  %v720_v53 = vand.u32 2147483648, %v1695_v1 }
 0x123   : > { %v713_v63 = vadd.f32 %v1759_v22, %v712_v42  ;;  %vm719_vm7 = vcmp.eq.f32.partialorder %v718_v58, 8.507059e+37 }
 0x124   : > { %v698_v6 = vadd.f32 %v697_v16, %v662_v2  ;;  %v680_v51 = vadd.f32 %v679_v36, %v649_v17  ;;  %v665_v2 = vmul.f32 %v1889_v24, %v544_v62  ;;  %v721_v16 = vor.u32 1.1754944e-38, %v720_v53 }
 0x125   : > { %v717_v38 = vsel %vm716_vm6, %v1759_v22, %v713_v63  ;;  %v2152_v22 = vmax.f32 %v1626_v30, 0.0  ;;  %v2155_v30 = vmax.f32 %v1692_v0, 0.0 }
 0x126   : > { %v699_v21 = vadd.f32 %v698_v6, %v663_v29  ;;  %v681_v54 = vrot.slane %v680_v51, 4  ;;  %v722_v25 = vsel %vm719_vm7, %v721_v16, %v717_v38 }
 0x128   : > { %v700_v11 = vadd.f32 %v699_v21, %v664_v48  ;;  %v682_v56 = vadd.f32 %v681_v54, %v680_v51  ;;  %v2150_v51 = vmax.f32 %v1583_v7, 0.0  ;;  %v2151_v21 = vmax.f32 %v1604_v18, 0.0 }
 0x129   : > { %v2154_v7 = vmax.f32 %v1675_v55, 0.0 }
 0x12a   : > { %v683_v36 = vrot.slane %v682_v56, 2  ;;  %v701_v17 = vadd.f32 %v700_v11, %v665_v2 }
 0x12c   : > { %v684_v29 = vadd.f32 %v683_v36, %v682_v56  ;;  %v702_v50 = vrot.slane %v701_v17, 4 }
 0x12e   : > { %v685_v6 = vrot.slane %v684_v29, 1  ;;  %v703_v1 = vadd.f32 %v702_v50, %v701_v17  ;;  %v2153_v50 = vmax.f32 %v1647_v37, 0.0 }
 0x130   : > { %v686_v42 = vadd.f32 %v685_v6, %v684_v29  ;;  %v704_v53 = vrot.slane %v703_v1, 2  ;;  %v2156_v6 = vmax.f32 %v1718_v43, 0.0 }
 0x132   : > { %v1922_v5 = vmul.f32 %v722_v25, %v686_v42  ;;  %v705_v56 = vadd.f32 %v704_v53, %v703_v1 }
 0x134   : > { %v725_v48 = vsub.f32 %v2150_v51, %v1922_v5  ;;  %v726_v54 = vsub.f32 %v2151_v21, %v1922_v5  ;;  %v727_v63 = vsub.f32 %v2152_v22, %v1922_v5  ;;  %v728_v11 = vsub.f32 %v2153_v50, %v1922_v5 }
 0x135   : > { %v729_v2 = vsub.f32 %v2154_v7, %v1922_v5  ;;  %v730_v17 = vsub.f32 %v2155_v30, %v1922_v5  ;;  %v731_v37 = vsub.f32 %v2156_v6, %v1922_v5  ;;  %v706_v55 = vrot.slane %v705_v56, 1 }
 0x136   : > { %v757_v38 = vmul.f32 %v1589_v12, %v725_v48  ;;  %v758_v58 = vmul.f32 %v1608_v19, %v726_v54  ;;  %v759_v18 = vmul.f32 %v1619_v26, %v727_v63  ;;  %v760_v29 = vmul.f32 %v1635_v33, %v728_v11 }
 0x137   : > { %v761_v42 = vmul.f32 %v1641_v35, %v729_v2  ;;  %v2157_v48 = vmax.f32 %v1773_v40, 0.0  ;;  %v762_v54 = vmul.f32 %v1685_v57, %v730_v17  ;;  %v707_v22 = vadd.f32 %v706_v55, %v705_v56 }
 0x138   : > { %v789_v36 = vmul.f32 %v757_v38, %v757_v38  ;;  %v790_v16 = vmul.f32 %v758_v58, %v758_v58  ;;  %v791_v1 = vmul.f32 %v759_v18, %v759_v18  ;;  %v792_v53 = vmul.f32 %v760_v29, %v760_v29 }
 0x139   : > { %v732_v21 = vsub.f32 %v2157_v48, %v1922_v5  ;;  %v2158_v63 = vmax.f32 %v1595_v14, 0.0  ;;  %v763_v43 = vmul.f32 %v1749_v52, %v731_v37  ;;  %v793_v58 = vmul.f32 %v761_v42, %v761_v42 }
 0x13a   : > { %v821_v51 = vadd.f32 %v790_v16, %v789_v36  ;;  %v1958_v11 = vmul.f32 %v722_v25, %v707_v22  ;;  %v2159_v7 = vmax.f32 %v1630_v31, 0.0  ;;  %v794_v18 = vmul.f32 %v762_v54, %v762_v54 }
 0x13b   : > { %v733_v38 = vsub.f32 %v2158_v63, %v1922_v5  ;;  %v764_v2 = vmul.f32 %v1778_v4, %v732_v21  ;;  %v2160_v56 = vmax.f32 %v1592_v13, 0.0  ;;  %v2161_v14 = vmax.f32 %v1662_v44, 0.0  ;;  %v2164_v44 = vld [vmem:[#allocation17_spill] sm:$0xff]  ;;  %v2167_v63 = vld [vmem:[#allocation18_spill] sm:$0xff] }
 0x13c   : > { %v822_v0 = vadd.f32 %v821_v51, %v791_v1  ;;  %v734_v40 = vsub.f32 %v2159_v7, %v1922_v5  ;;  %v2162_v25 = vmax.f32 %v1763_v41, 0.0  ;;  %v795_v31 = vmul.f32 %v763_v43, %v763_v43 }
 0x13d   : > { %v741_v16 = vsub.f32 %v2160_v56, %v1958_v11  ;;  %v742_v30 = vsub.f32 %v2161_v14, %v1958_v11  ;;  %v765_v29 = vmul.f32 %v1612_v20, %v733_v38  ;;  %v2163_v37 = vmax.f32 %v1793_v61, 0.0 }
 0x13e   : > { %v823_v50 = vadd.f32 %v822_v0, %v792_v53  ;;  %v735_v17 = vsub.f32 %v2162_v25, %v1922_v5  ;;  %v766_v13 = vmul.f32 %v1622_v27, %v734_v40  ;;  %v796_v1 = vmul.f32 %v764_v2, %v764_v2 }
 0x13f   : > { %v736_v42 = vsub.f32 %v2163_v37, %v1922_v5  ;;  %v2165_v55 = vmax.f32 %v2164_v44, 0.0  ;;  %v773_v48 = vmul.f32 %v1589_v12, %v741_v16  ;;  %v774_v21 = vmul.f32 %v1608_v19, %v742_v30  ;;  %v863_v16 = vld [vmem:[#allocation2] sm:$0x3] }
 0x140   : > { %v824_v36 = vadd.f32 %v823_v50, %v793_v58  ;;  %v2166_v54 = vmax.f32 %v1807_v49, 0.0  ;;  %v767_v53 = vmul.f32 %v1638_v34, %v735_v17  ;;  %v797_v0 = vmul.f32 %v765_v29, %v765_v29  ;;  %v2170_v49 = vld [vmem:[#allocation19_spill] sm:$0xff] }
 0x141   : > { %v743_v41 = vsub.f32 %v2165_v55, %v1958_v11  ;;  %v2168_v38 = vmax.f32 %v2167_v63, 0.0  ;;  %v2169_v58 = vmax.f32 %v1823_v8, 0.0  ;;  %v768_v12 = vmul.f32 %v1665_v46, %v736_v42  ;;  %v2172_v8 = vld [vmem:[#allocation20_spill] sm:$0xff] }
 0x142   : > { %v825_v6 = vadd.f32 %v824_v36, %v794_v18  ;;  %v737_v61 = vsub.f32 %v2166_v54, %v1922_v5  ;;  %v798_v19 = vmul.f32 %v766_v13, %v766_v13  ;;  %v2171_v40 = vmax.f32 %v2170_v49, 0.0 }
 0x143   : > { %v744_v43 = vsub.f32 %v2168_v38, %v1958_v11  ;;  %v738_v50 = vsub.f32 %v2169_v58, %v1922_v5  ;;  %v775_v18 = vmul.f32 %v1619_v26, %v743_v41  ;;  %v805_v36 = vmul.f32 %v773_v48, %v773_v48 }
 0x144   : > { %v826_v51 = vadd.f32 %v825_v6, %v795_v31  ;;  %v745_v2 = vsub.f32 %v2171_v40, %v1958_v11  ;;  %v806_v56 = vmul.f32 %v774_v21, %v774_v21  ;;  %v769_v14 = vmul.f32 %v1797_v28, %v737_v61 }
 0x145   : > { %v799_v30 = vmul.f32 %v767_v53, %v767_v53  ;;  %v865_v17 = vrot.slane %v863_v16, 1  ;;  %v2173_v29 = vmax.f32 %v2172_v8, 0.0  ;;  %v776_v6 = vmul.f32 %v1635_v33, %v744_v43  ;;  %v2178_v43 = vld [vmem:[#allocation16_spill] sm:$0xff] }
 0x146   : > { %v827_v22 = vadd.f32 %v826_v51, %v796_v1  ;;  %v887_v37 = vstv %s886_s19  ;;  %v2174_v42 = vmax.f32 %v1826_v47, 0.0  ;;  %v770_v26 = vmul.f32 %v1838_v59, %v738_v50 }
 0x147   : > { %v746_v31 = vsub.f32 %v2173_v29, %v1958_v11  ;;  %v800_v1 = vmul.f32 %v768_v12, %v768_v12  ;;  %v2175_v44 = vmax.f32 %v1757_v32, 0.0  ;;  %v777_v41 = vmul.f32 %v1641_v35, %v745_v2 }
 0x148   : > { %v828_v7 = vadd.f32 %v827_v22, %v797_v0  ;;  %v739_v13 = vsub.f32 %v2174_v42, %v1922_v5  ;;  %v807_v48 = vmul.f32 %v775_v18, %v775_v18  ;;  %v842_v21 = vadd.f32 %v806_v56, %v805_v36 }
 0x149   : > { %v747_v55 = vsub.f32 %v2175_v44, %v1958_v11  ;;  %v801_v54 = vmul.f32 %v769_v14, %v769_v14  ;;  %v2016_v33 = vsub.f32 %v1922_v5, %v863_v16  ;;  %v2019_v47 = vsub.f32 %v1958_v11, %v865_v17 }
 0x14a   : > { %v829_v25 = vadd.f32 %v828_v7, %v798_v19  ;;  %v2176_v53 = vmax.f32 %v1815_v9, 0.0  ;;  %v778_v22 = vmul.f32 %v1685_v57, %v746_v31  ;;  %v808_v32 = vmul.f32 %v776_v6, %v776_v6 }
 0x14b   : > { %v843_v63 = vadd.f32 %v842_v21, %v807_v48  ;;  %v2177_v35 = vmax.f32 %v1858_v39, 0.0  ;;  %v2179_v58 = vmax.f32 %v2178_v43, 0.0  ;;  %v889_v12 = vmul.f32 %v887_v37, %v2019_v47 }
 0x14c   : > { %v830_v51 = vadd.f32 %v829_v25, %v799_v30  ;;  %v748_v0 = vsub.f32 %v2176_v53, %v1958_v11  ;;  %v779_v7 = vmul.f32 %v1749_v52, %v747_v55  ;;  %v809_v9 = vmul.f32 %v777_v41, %v777_v41  ;;  %v2181_v30 = vld [vmem:[#allocation21_spill] sm:$0xff] }
 0x14d   : > { %v740_v38 = vsub.f32 %v2177_v35, %v1922_v5  ;;  %v749_v50 = vsub.f32 %v2179_v58, %v1958_v11  ;;  %v844_v49 = vadd.f32 %v843_v63, %v808_v32  ;;  %v771_v57 = vmul.f32 %v1855_v10, %v739_v13 }
 0x14e   : > { %v831_v61 = vadd.f32 %v830_v51, %v800_v1  ;;  %v802_v40 = vmul.f32 %v770_v26, %v770_v26  ;;  %v888_v2 = vmul.f32 %v887_v37, %v2016_v33  ;;  %v892_v18 = vrot.slane %v889_v12, 7 }
 0x14f   : > { %v2180_v39 = vmax.f32 %v1701_v3, 0.0  ;;  %v780_v36 = vmul.f32 %v1778_v4, %v748_v0  ;;  %v810_v56 = vmul.f32 %v778_v22, %v778_v22  ;;  %v845_v14 = vadd.f32 %v844_v49, %v809_v9  ;;  %v2186_v0 = vld [vmem:[#allocation22_spill] sm:$0xff] }
 0x150   : > { %v832_v19 = vadd.f32 %v831_v61, %v801_v54  ;;  %v2182_v25 = vmax.f32 %v2181_v30, 0.0  ;;  %v781_v17 = vmul.f32 %v1612_v20, %v749_v50  ;;  %v894_v8 = vsel %vm893_vm8, %v892_v18, %v888_v2 }
 0x151   : > { %v750_v5 = vsub.f32 %v2180_v39, %v1958_v11  ;;  %v811_v31 = vmul.f32 %v779_v7, %v779_v7  ;;  %v846_v6 = vadd.f32 %v845_v14, %v810_v56  ;;  %v896_v37 = vadd.f32 %v894_v8, %v863_v16  ;;  %v898_v8 = vld [vmem:[#allocation3] sm:$0x3] }
 0x152   : > { %v751_v52 = vsub.f32 %v2182_v25, %v1958_v11  ;;  %v833_v29 = vadd.f32 %v832_v19, %v802_v40  ;;  %v772_v42 = vmul.f32 %v1889_v24, %v740_v38  ;;  %v803_v3 = vmul.f32 %v771_v57, %v771_v57 }
 0x153   : > { %v2183_v4 = vmax.f32 %v1833_v60, 0.0  ;;  %v782_v26 = vmul.f32 %v1622_v27, %v750_v5  ;;  %v812_v1 = vmul.f32 %v780_v36, %v780_v36  ;;  %v847_v51 = vadd.f32 %v846_v6, %v811_v31  ;;  %897 = vst [vmem:[#allocation2] sm:$0x3] %v896_v37 }
 0x154   : > { %v2184_v20 = vmax.f32 %v1850_v45, 0.0  ;;  %v834_v55 = vadd.f32 %v833_v29, %v803_v3  ;;  %v783_v41 = vmul.f32 %v1638_v34, %v751_v52  ;;  %v813_v16 = vmul.f32 %v781_v17, %v781_v17 }
 0x155   : > { %v752_v13 = vsub.f32 %v2183_v4, %v1958_v11  ;;  %v848_v48 = vadd.f32 %v847_v51, %v812_v1  ;;  %v804_v21 = vmul.f32 %v772_v42, %v772_v42  ;;  %v2185_v54 = vmax.f32 %v1871_v23, 0.0 }
 0x156   : > { %v753_v44 = vsub.f32 %v2184_v20, %v1958_v11  ;;  %v814_v27 = vmul.f32 %v782_v26, %v782_v26  ;;  %v2187_v22 = vmax.f32 %v2186_v0, 0.0  ;;  %v815_v35 = vmul.f32 %v783_v41, %v783_v41 }
 0x157   : > { %v754_v60 = vsub.f32 %v2185_v54, %v1958_v11  ;;  %v784_v61 = vmul.f32 %v1665_v46, %v752_v13  ;;  %v849_v53 = vadd.f32 %v848_v48, %v813_v16  ;;  %v835_v45 = vadd.f32 %v834_v55, %v804_v21 }
 0x158   : > { %v755_v32 = vsub.f32 %v2187_v22, %v1958_v11  ;;  %v785_v63 = vmul.f32 %v1797_v28, %v753_v44  ;;  %v756_v38 = vsub.f32 %v544_v62, %v1958_v11  ;;  %v904_v25 = vmul.f32 %v2016_v33, %v2016_v33 }
 0x159   : > { %v850_v34 = vadd.f32 %v849_v53, %v814_v27  ;;  %v786_v23 = vmul.f32 %v1838_v59, %v754_v60  ;;  %v816_v46 = vmul.f32 %v784_v61, %v784_v61  ;;  %v836_v58 = vrot.slane %v835_v45, 4 }
 0x15a   : > { %v787_v50 = vmul.f32 %v1855_v10, %v755_v32  ;;  %v817_v12 = vmul.f32 %v785_v63, %v785_v63  ;;  %v788_v28 = vmul.f32 %v1889_v24, %v756_v38  ;;  %v905_v10 = vmul.f32 %v2019_v47, %v2019_v47 }
 0x15b   : > { %v851_v43 = vadd.f32 %v850_v34, %v815_v35  ;;  %v818_v7 = vmul.f32 %v786_v23, %v786_v23  ;;  %v837_v49 = vadd.f32 %v836_v58, %v835_v45  ;;  %v924_v24 = vstv %s923_s15 }
 0x15c   : > { %v819_v57 = vmul.f32 %v787_v50, %v787_v50  ;;  %v820_v62 = vmul.f32 %v788_v28, %v788_v28  ;;  %v926_v14 = vmul.f32 %v924_v24, %v905_v10  ;;  %v925_v6 = vmul.f32 %v924_v24, %v904_v25 }
 0x15d   : > { %v852_v19 = vadd.f32 %v851_v43, %v816_v46  ;;  %v838_v59 = vrot.slane %v837_v49, 2 }
 0x15e   : > { %v929_v29 = vrot.slane %v926_v14, 7 }
 0x15f   : > { %v853_v9 = vadd.f32 %v852_v19, %v817_v12  ;;  %v839_v18 = vadd.f32 %v838_v59, %v837_v49 }
 0x160   : > { %v930_v42 = vsel %vm893_vm8, %v929_v29, %v925_v6 }
 0x161   : > { %v854_v15 = vadd.f32 %v853_v9, %v818_v7  ;;  %v840_v36 = vrot.slane %v839_v18, 1 }
 0x163   : > { %v855_v11 = vadd.f32 %v854_v15, %v819_v57  ;;  %v841_v52 = vadd.f32 %v840_v36, %v839_v18 }
 0x165   : > { %v856_v40 = vadd.f32 %v855_v11, %v820_v62 }
 0x167   : > { %v857_v2 = vrot.slane %v856_v40, 4 }
 0x169   : > { %v858_v39 = vadd.f32 %v857_v2, %v856_v40 }
 0x16b   : > { %v859_v5 = vrot.slane %v858_v39, 2 }
 0x16d   : > { %v860_v56 = vadd.f32 %v859_v5, %v858_v39 }
 0x16f   : > { %v861_v30 = vrot.slane %v860_v56, 1 }
 0x171   : > { %v862_v17 = vadd.f32 %v861_v30, %v860_v56 }
 0x173   : > { %v901_v31 = vsel %vm893_vm8, %v862_v17, %v841_v52 }
 0x174   : > { %v903_v37 = vadd.f32 %v901_v31, %v898_v8  ;;  %937 = sbr.rel (%p1151_p1) target bundleno = 410 (0x19a), region = 48 }
 0x176   : > { %v932_v47 = vadd.f32 %v930_v42, %v903_v37 }
 0x178   : > { %933 = vst [vmem:[#allocation3] sm:$0x3] %v932_v47 }
 0x179   : > { %v953_v3 = vld [vmem:[#allocation2] sm:$0x3] }
 0x17a   : > { %954 = vst [vmem:[#allocation9] sm:$0x3] %v953_v3 }
 0x17f   : > { %v938_v4 = vld [vmem:[#allocation3] sm:$0x3] }
 0x180   : > { %v939_v13 = vmul.f32 0.004, %v938_v4 }
 0x182   : > { %v940_v33 = vmax.f32 %v939_v13, 1e-06 }
 0x184   : > { %1281 = vrsqrt.f32 %v940_v33  ;;  %vm948_vm9 = vcmp.eq.f32.partialorder %v940_v33, inf  ;;  %v951_v41 = vand.u32 2147483648, %v940_v33  ;;  %vm950_vm10 = vcmp.eq.f32.partialorder %v940_v33, 0.0 }
 0x18a   : > { %v1282_v26 = vpop.eup %1281 }
 0x18b   : > { %v942_v1 = vmul.f32 %v1282_v26, %v940_v33 }
 0x18d   : > { %v943_v51 = vmul.f32 %v1282_v26, %v942_v1 }
 0x18f   : > { %v944_v20 = vmul.f32 0.5, %v943_v51 }
 0x191   : > { %v945_v44 = vsub.f32 1.5, %v944_v20 }
 0x193   : > { %v946_v55 = vmul.f32 %v1282_v26, %v945_v44 }
 0x195   : > { %v947_v16 = vmul.f32 %v946_v55, %v940_v33 }
 0x197   : > { %v949_v48 = vsel %vm948_vm9, %v940_v33, %v947_v16 }
 0x198   : > { %v952_v21 = vsel %vm950_vm10, %v951_v41, %v949_v48 }
 0x199   : > { %955 = vst [vmem:[#allocation9 + $0x2] sm:$0x3] %v952_v21 }
 0x19a PF: > { %p1230_p2 = scmp.eq.s32.totalorder %s1436_s16, 1  ;;  %s1396_s25 = smov [#allocation9]  }
 0x19b   : > { %s962_s26 = sshll.u32 %s1396_s25, 4  ;;  %s964_s29 = sshll.u32 %s2098_s3, 4  ;;  %s963_s26 = int_to_ptr.vmem [resolvable:$true] %s962_s26  ;;  %s965_s29 = int_to_ptr.hbm [resolvable:$true] %s964_s29 }
 0x19c   : > { %1221 = dma.vmem_to_hbm [thread:$0]  (%p1230_p2), %s963_s26, 64, %s965_s29, [#allocation6]  }
 0x19d   : > { %1366 = dma.done.wait (%p1230_p2), [#allocation6], 64  }
 0x19e   : > { %1368 = vsyncadd (%p1230_p2), [#allocation6], 4294967232 }
 0x19f PF: > { %p15_p3 = scmp.ge.s32.totalorder %s1439_s17, 4   ;;  %s2188_s12 = smov %s1375_s13 }
 0x1a0   : > { %s2189_s13 = smov %s1379_s14  ;;  %s2190_s14 = smov %s1449_s20 }
 0x1a1   : > { %s2191_s15 = smov %s1439_s17  ;;  %17 = sbr.rel (!%p15_p3) target bundleno = 5 (0x5), region = 86 }
 0x1a6   :  { %978 = vsyncpa [#allocation5], 1 }
 0x1a7   :  { %980 = vsyncpa [#allocation5 + $0x1], 1 }
 0x1a8   :  { %981 = vsyncpa [#allocation8], 1 }
 0x1a9   :  { %982 = vsyncpa [#allocation6], 1 }
 0x1aa   :  { %984 = vsyncpa [#allocation6 + $0x1], 1 }

</bundles_post_ra>
